<compile_context>
chip_gen: v7x
topology: tpu7x:2x2x1
jax: 0.10.0
libtpu: 0.0.40
codegen_flags: <defaults>
</compile_context>

<pallas_src>
import jax
import jax.numpy as jnp
from jax import lax
from jax.experimental import pallas as pl
from jax.experimental.pallas import tpu as pltpu

BN_EPS = 1e-5


def _residual_kernel(x_ref, w_ref, params_ref, out_ref):
    x = x_ref[...]                                    # (B, i) float32
    w = w_ref[...]                                    # (o, i) float32 — no transpose needed

    # Linear: x @ W^T + b on the MXU (contract dim 1 of x with dim 1 of w).
    y = lax.dot_general(
        x, w,
        dimension_numbers=(((1,), (1,)), ((), ())),
        preferred_element_type=jnp.float32,
    ) + params_ref[0:1, :]                            # bias row

    # BatchNorm1d (training mode): batch mean / biased batch variance over axis 0.
    mean = jnp.mean(y, axis=0, keepdims=True)         # (1, o)
    centered = y - mean
    var = jnp.mean(centered * centered, axis=0, keepdims=True)
    y_hat = centered * lax.rsqrt(var + BN_EPS)
    y_bn = params_ref[1:2, :] * y_hat + params_ref[2:3, :]   # gamma * y_hat + beta

    # ReLU
    y_act = jnp.maximum(y_bn, 0.0)

    # torch.cat([out, input_], dim=1): build in registers, one full-tile store.
    out_ref[...] = jnp.concatenate([y_act, x], axis=1).astype(out_ref.dtype)


def residual_forward(x, weight, bias, gamma, beta):
    """x: (B, i) float32; weight: (o, i); bias/gamma/beta: (o,). Returns (B, o + i)."""
    B, in_dim = x.shape
    out_dim = weight.shape[0]

    # Pack the three per-feature vectors into one (3, o) array -> single DMA.
    params = jnp.stack(
        [bias.astype(jnp.float32),
         gamma.astype(jnp.float32),
         beta.astype(jnp.float32)],
        axis=0,
    )                                                 # (3, o)

    vmem = pl.BlockSpec(memory_space=pltpu.MemorySpace.VMEM)

    return pl.pallas_call(
        _residual_kernel,
        out_shape=jax.ShapeDtypeStruct((B, out_dim + in_dim), jnp.float32),
        in_specs=[vmem, vmem, vmem],
        out_specs=vmem,
    )(x, weight, params)


def _reference(x, weight, bias, gamma, beta):
    y = x @ weight.T + bias
    mean = jnp.mean(y, axis=0, keepdims=True)
    var = jnp.mean((y - mean) ** 2, axis=0, keepdims=True)
    y = gamma * (y - mean) / jnp.sqrt(var + BN_EPS) + beta
    y = jnp.maximum(y, 0.0)
    return jnp.concatenate([y, x], axis=1)


if __name__ == "__main__":
    key = jax.random.PRNGKey(0)
    B, i, o = 16, 32, 64

    kx, kw, kb = jax.random.split(key, 3)
    x = jax.random.normal(kx, (B, i), dtype=jnp.float32)
    # Deterministic parameter init (mimics Linear's uniform(-1/sqrt(i), 1/sqrt(i)) scale)
    bound = 1.0 / (i ** 0.5)
    weight = jax.random.uniform(kw, (o, i), minval=-bound, maxval=bound, dtype=jnp.float32)
    bias = jax.random.uniform(kb, (o,), minval=-bound, maxval=bound, dtype=jnp.float32)
    gamma = jnp.ones((o,), jnp.float32)   # BatchNorm1d affine init
    beta = jnp.zeros((o,), jnp.float32)

    out = residual_forward(x, weight, bias, gamma, beta)
    jax.block_until_ready(out)

    ref = _reference(x, weight, bias, gamma, beta)
    assert out.shape == (B, o + i)
    assert jnp.allclose(out, ref, atol=1e-4, rtol=1e-4)
    print("KERNEL_OK")
</pallas_src>

<mosaic_0001>
module attributes {stable_mosaic.version = 11 : i64} {
  func.func @_residual_kernel(%arg0: memref<16x32xf32, #tpu.memory_space<vmem>>, %arg1: memref<64x32xf32, #tpu.memory_space<vmem>>, %arg2: memref<3x64xf32, #tpu.memory_space<vmem>>, %arg3: memref<16x96xf32, #tpu.memory_space<vmem>>) attributes {dimension_semantics = [], scalar_prefetch = 0 : i64, scratch_operands = 0 : i64, tpu.core_type = #tpu.core_type<tc>} {
    %c0 = arith.constant 0 : index
    %c0_0 = arith.constant 0 : index
    %0 = vector.load %arg0[%c0, %c0_0] : memref<16x32xf32, #tpu.memory_space<vmem>>, vector<16x32xf32>
    %c0_1 = arith.constant 0 : index
    %c0_2 = arith.constant 0 : index
    %1 = vector.load %arg1[%c0_1, %c0_2] : memref<64x32xf32, #tpu.memory_space<vmem>>, vector<64x32xf32>
    %cst = arith.constant dense<0.000000e+00> : vector<16x64xf32>
    %2 = tpu.matmul %0, %1, %cst {dimension_numbers = #tpu.dot_dimension_numbers<[1], [1], [0], [0], [0, 0, 1, 0], [], []>} : vector<16x32xf32>, vector<64x32xf32>, vector<16x64xf32> -> vector<16x64xf32>
    %c0_3 = arith.constant 0 : index
    %c0_4 = arith.constant 0 : index
    %3 = vector.load %arg2[%c0_3, %c0_4] : memref<3x64xf32, #tpu.memory_space<vmem>>, vector<1x64xf32>
    %4 = vector.broadcast %3 : vector<1x64xf32> to vector<16x64xf32>
    %5 = arith.addf %2, %4 : vector<16x64xf32>
    %cst_5 = arith.constant dense<0.000000e+00> : vector<64xf32>
    %6 = vector.multi_reduction <add>, %5, %cst_5 [0] : vector<16x64xf32> to vector<64xf32>
    %7 = vector.shape_cast %6 : vector<64xf32> to vector<1x64xf32>
    %cst_6 = arith.constant 1.600000e+01 : f32
    %8 = vector.broadcast %cst_6 : f32 to vector<1x64xf32>
    %9 = arith.divf %7, %8 : vector<1x64xf32>
    %10 = vector.broadcast %9 : vector<1x64xf32> to vector<16x64xf32>
    %11 = arith.subf %5, %10 : vector<16x64xf32>
    %12 = arith.mulf %11, %11 : vector<16x64xf32>
    %cst_7 = arith.constant dense<0.000000e+00> : vector<64xf32>
    %13 = vector.multi_reduction <add>, %12, %cst_7 [0] : vector<16x64xf32> to vector<64xf32>
    %14 = vector.shape_cast %13 : vector<64xf32> to vector<1x64xf32>
    %cst_8 = arith.constant 1.600000e+01 : f32
    %15 = vector.broadcast %cst_8 : f32 to vector<1x64xf32>
    %16 = arith.divf %14, %15 : vector<1x64xf32>
    %cst_9 = arith.constant 9.99999974E-6 : f32
    %17 = vector.broadcast %cst_9 : f32 to vector<1x64xf32>
    %18 = arith.addf %16, %17 : vector<1x64xf32>
    %19 = math.rsqrt %18 : vector<1x64xf32>
    %20 = vector.broadcast %19 : vector<1x64xf32> to vector<16x64xf32>
    %21 = arith.mulf %11, %20 : vector<16x64xf32>
    %c1 = arith.constant 1 : index
    %c0_10 = arith.constant 0 : index
    %22 = vector.load %arg2[%c1, %c0_10] : memref<3x64xf32, #tpu.memory_space<vmem>>, vector<1x64xf32>
    %23 = vector.broadcast %22 : vector<1x64xf32> to vector<16x64xf32>
    %24 = arith.mulf %23, %21 : vector<16x64xf32>
    %c2 = arith.constant 2 : index
    %c0_11 = arith.constant 0 : index
    %25 = vector.load %arg2[%c2, %c0_11] : memref<3x64xf32, #tpu.memory_space<vmem>>, vector<1x64xf32>
    %26 = vector.broadcast %25 : vector<1x64xf32> to vector<16x64xf32>
    %27 = arith.addf %24, %26 : vector<16x64xf32>
    %cst_12 = arith.constant 0.000000e+00 : f32
    %28 = vector.broadcast %cst_12 : f32 to vector<16x64xf32>
    %29 = arith.maximumf %27, %28 : vector<16x64xf32>
    %30 = tpu.concatenate %29, %0 in 1 : vector<16x64xf32>, vector<16x32xf32> -> vector<16x96xf32>
    %c0_13 = arith.constant 0 : index
    %c0_14 = arith.constant 0 : index
    %31 = vector.load %arg3[%c0_13, %c0_14] : memref<16x96xf32, #tpu.memory_space<vmem>>, vector<16x96xf32>
    tpu.vector_store %arg3[%c0_13, %c0_14], %30 {strides = array<i32>} : memref<16x96xf32, #tpu.memory_space<vmem>>, vector<16x96xf32>,
    return
  }
}

</mosaic_0001>

<bundles_post_ra>
// kernel: tpu_custom_call.1
= control target key start
LH: loop header
LB: loop body
LE: loop exit
PB: predicated region body
PF: predicated region fallthrough
CT: control target
= control target key end

     0   :  { %vm30_vm0 = vcmask 261120   ;;  %s410_s0 = inlined_call_operand.vmem [shape: f32[16,32], index: 0, kind: input, shape index: {}]   ;;  %s411_s1 = inlined_call_operand.vmem [shape: f32[64,32], index: 1, kind: input, shape index: {}]   ;;  %s412_s2 = inlined_call_operand.vmem [shape: f32[3,64], index: 2, kind: input, shape index: {}]   ;;  %s413_s3 = inlined_call_operand.hbm [shape: f32[16,96], index: 3, kind: output, shape index: {}]  }
   0x1   :  { %v17_v0 = vld [vmem:[%s411_s1] sm:$0xff]  ;;  %v18_v1 = vld [vmem:[%s411_s1 + $0x8] sm:$0xff]  ;;  %v19_v2 = vld [vmem:[%s411_s1 + $0x10] sm:$0xff] }
   0x2   :  { %v251_v3 = vpack.c.bf16 %v18_v1, %v17_v0  ;;  %vm340_vm1 = vmpackc.low %vm30_vm0, %vm30_vm0  ;;  %v20_v5 = vld [vmem:[%s411_s1 + $0x18] sm:$0xff]  ;;  %v15_v7 = vld [vmem:[%s410_s0] sm:$0xff] }
   0x3   :  { %v257_v6 = vpack.c.bf16 %v20_v5, %v19_v2 }
   0x4   :  { %253 = vmatprep.subr.msk.bf16.mxu0 %vm340_vm1, %v251_v3 }
   0x5   :  { %8 = vsyncpa [#allocation3], 0  ;;  %256 = vmatpush3.bf16.xpose.msk.msra.mxu0 %vm340_vm1, %v251_v3  ;;  %248 = vmatprep.mubr.msk.f32.mxu0 %vm30_vm0, %v15_v7  ;;  %s305_s22 = smov 64   ;;  %v21_v8 = vld [vmem:[%s411_s1 + $0x20] sm:$0xff]  ;;  %v22_v9 = vld [vmem:[%s411_s1 + $0x28] sm:$0xff]  ;;  %vm136_vm2 = vcmask 523264  }
   0x6   :  { %259 = vmatprep.subr.msk.bf16.mxu0 %vm340_vm1, %v257_v6  ;;  %182 = vrot.lane.b32.xlu0 %v15_v7, %s305_s22  ;;  %v16_v10 = vld [vmem:[%s410_s0 + $0x8] sm:$0xff]  ;;  %v263_v11 = vpack.c.bf16 %v22_v9, %v21_v8  ;;  %v23_v12 = vld [vmem:[%s411_s1 + $0x30] sm:$0xff]  ;;  %v24_v13 = vld [vmem:[%s411_s1 + $0x38] sm:$0xff]  ;;  %s306_s10 = smov [#allocation2]   ;;  %vm190_vm3 = vcmask 785408  }
   0x7   :  { %v269_v14 = vpack.c.bf16 %v24_v13, %v23_v12  ;;  %v209_v15 = vld [vmem:[%s412_s2] ss:$0 sm:$0xff]  ;;  %v220_v46 = vld [vmem:[%s412_s2 + $0x1] ss:$0 sm:$0xff]  ;;  %v221_v50 = vld [vmem:[%s412_s2 + $0x2] ss:$0 sm:$0xff] }
   0x8   :  { %s198_s11 = sshll.u32 %s306_s10, 4  ;;  %s199_s11 = int_to_ptr.vmem [resolvable:$true] %s198_s11 }
   0x9   :  { %s281_s12 = scalar_lea.vmem %s199_s11, 256  ;;  %p286_p1 = scmp.lt.s32.totalorder %s199_s11, %s199_s11 }
   0xa   :  { %184 = vrot.lane.b32.xlu0 %v16_v10, %s305_s22  ;;  %p282_p0 = scmp.ne.s32.totalorder %s199_s11, %s281_s12  ;;  %p287_p2 = scmp.lt.s32.totalorder %s281_s12, %s281_s12 }
   0xc   :  { %p288_p3 = por %p287_p2, %p286_p1 }
   0xd   :  { %262 = vmatpush3.bf16.xpose.msk.msra.mxu0 %vm340_vm1, %v257_v6 }
   0xe   :  { %265 = vmatprep.subr.msk.bf16.mxu0 %vm340_vm1, %v263_v11  ;;  %p289_p4 = pnand %p288_p3, %p282_p0 }
  0x15   :  { %268 = vmatpush3.bf16.xpose.msk.msra.mxu0 %vm340_vm1, %v263_v11 }
  0x16   :  { %271 = vmatprep.subr.msk.bf16.mxu0 %vm340_vm1, %v269_v14 }
  0x1d   :  { %274 = vmatpush3.bf16.xpose.msk.msra.mxu0 %vm340_vm1, %v269_v14 }
  0x24   :  { %249 = vmatmul.mubr.msk.f32.vlgmr.msra.gmra.mrb[0].mxu0 %vm30_vm0, %v16_v10 }
  0x78   :  { %v183_v47 = vpop.permute.xlu0 %182 }
  0x7c   :  { %v185_v55 = vpop.permute.xlu0 %184 }
  0xf7   :  { %v250_v16 = vpop.f32.mrb[0].mxu0 }
  0xf8   :  { %v133_v17 = vadd.f32 %v250_v16, %v209_v15  ;;  %v127_v18 = vpop.f32.mrb[1].mxu0 }
  0xf9   :  { %v128_v19 = vadd.f32 %v209_v15, %v127_v18 }
  0xfa   :  { %v138_v20 = vsel %vm136_vm2, %v133_v17, 0.0 }
  0xfb   :  { %v137_v21 = vsel %vm136_vm2, %v128_v19, 0.0 }
  0xfc   :  { %v139_v22 = vadd.f32 %v138_v20, %v137_v21 }
  0xfe   :  { %v140_v23 = vrot.slane %v139_v22, 4 }
 0x100   :  { %v141_v24 = vadd.f32 %v140_v23, %v139_v22 }
 0x102   :  { %v142_v25 = vrot.slane %v141_v24, 2 }
 0x104   :  { %v143_v26 = vadd.f32 %v142_v25, %v141_v24 }
 0x106   :  { %v144_v27 = vrot.slane %v143_v26, 1 }
 0x108   :  { %v145_v28 = vadd.f32 %v144_v27, %v143_v26 }
 0x10a   :  { %v147_v29 = vmul.f32 0.0625, %v145_v28 }
 0x10c   :  { %v148_v30 = vsub.f32 %v128_v19, %v147_v29  ;;  %v149_v31 = vsub.f32 %v133_v17, %v147_v29 }
 0x10e   :  { %v150_v32 = vmul.f32 %v148_v30, %v148_v30  ;;  %v151_v33 = vmul.f32 %v149_v31, %v149_v31 }
 0x110   :  { %v152_v34 = vsel %vm136_vm2, %v150_v32, 0.0  ;;  %v153_v35 = vsel %vm136_vm2, %v151_v33, 0.0 }
 0x111   :  { %v154_v36 = vadd.f32 %v153_v35, %v152_v34 }
 0x113   :  { %v155_v37 = vrot.slane %v154_v36, 4 }
 0x115   :  { %v156_v38 = vadd.f32 %v155_v37, %v154_v36 }
 0x117   :  { %v157_v39 = vrot.slane %v156_v38, 2 }
 0x119   :  { %v158_v40 = vadd.f32 %v157_v39, %v156_v38 }
 0x11b   :  { %v159_v41 = vrot.slane %v158_v40, 1 }
 0x11d   :  { %v160_v42 = vadd.f32 %v159_v41, %v158_v40 }
 0x11f   :  { %v161_v43 = vmul.f32 0.0625, %v160_v42 }
 0x121   :  { %v162_v44 = vadd.f32 1e-05, %v161_v43 }
 0x123   :  { %279 = vrsqrt.f32 %v162_v44 }
 0x12d   :  { %v280_v45 = vpop.eup %279 }
 0x12e   :  { %v164_v48 = vmul.f32 %v280_v45, %v148_v30  ;;  %v165_v49 = vmul.f32 %v280_v45, %v149_v31 }
 0x130   :  { %v171_v51 = vmul.f32 %v220_v46, %v164_v48  ;;  %v172_v52 = vmul.f32 %v220_v46, %v165_v49 }
 0x132   :  { %v178_v53 = vadd.f32 %v221_v50, %v171_v51  ;;  %v179_v54 = vadd.f32 %v221_v50, %v172_v52 }
 0x134   :  { %v180_v56 = vmax.f32 %v178_v53, 0.0  ;;  %v181_v57 = vmax.f32 %v179_v54, 0.0 }
 0x136   :  { %v188_v58 = vsel %vm136_vm2, %v180_v56, %v183_v47  ;;  %v189_v59 = vsel %vm136_vm2, %v181_v57, %v185_v55 }
 0x137   :  { %191 = vst.msk [vmem:[#allocation2] sm:$0xff] %vm190_vm3, %v188_v58  ;;  %192 = vst.msk [vmem:[#allocation2 + $0x8] sm:$0xff] %vm190_vm3, %v189_v59 }
 0x138   :  { %292 = shalt.err (!%p289_p4)
}
 0x139   :  { %s293_s14 = scalar_lea.hbm %s413_s3, 256 }
 0x13a   :  { %p294_p5 = scmp.ne.s32.totalorder %s413_s3, %s293_s14  ;;  %p297_p6 = scmp.lt.u32.totalorder %s293_s14, %s413_s3 }
 0x13c   :  { %p299_p7 = pnand %p297_p6, %p294_p5 }
 0x13e   :  { %302 = shalt.err (!%p299_p7)
}
 0x13f   :  { %s307_s19 = smov 128   ;;  %s308_s20 = smov 8  }
 0x140   :  { %204 = dma.vmem_to_hbm [thread:$0]  %s199_s11, 256, %s413_s3, [#allocation3], %s307_s19, %s307_s19, %s308_s20  }
 0x141   :  { %303 = dma.done.wait [#allocation3], 256  }
 0x142   :  { %304 = vsyncadd [#allocation3], 4294967040 }
 0x143   :  { %208 = vsyncpa [#allocation3], 1 }

</bundles_post_ra>
